<compile_context>
chip_gen: v5e
topology: v5e:2x2
jax: 0.10.0
libtpu: 0.0.40
codegen_flags: <defaults>
</compile_context>

<pallas_src>
import functools

import jax
import jax.numpy as jnp
from jax.experimental import pallas as pl
from jax.experimental.pallas import tpu as pltpu


def _mixed_encoder_kernel(x_ref, u_ref, out_ref, *, T, n_bits):
    # x_ref:   (TM, LW)        float32, pixel values in [0, 255]
    # u_ref:   (T, TM, LW)     float32, uniform [0, 1)
    # out_ref: (T+n_bits, TM, LW)
    x = x_ref[...]
    norm = x * (1.0 / 255.0)

    # ---- Poisson (Bernoulli rate) encoding: spike where u <= x/255 ----
    for t in range(T):
        out_ref[t] = (u_ref[t] <= norm).astype(out_ref.dtype)

    # ---- Bit-plane encoding via integer bit extraction (== repeated mod/floor-div by 2) ----
    xi = x.astype(jnp.int32)
    for k in range(n_bits):
        out_ref[T + k] = ((xi >> k) & 1).astype(out_ref.dtype)


def mixed_encoder(x, key, *, T=10, out_dtype=jnp.float32):
    """x: (B, C, H, W) float32 with integer values in [0, 255].

    Returns (T+8, B, C, H, W) of dtype `out_dtype` (float32 matches the PyTorch module;
    bfloat16 is a valid option since every value is in {0, 1} — halves HBM writeback).
    """
    B, C, H, W = x.shape
    n_bits = 8  # math.ceil(math.log2(255))
    N = B * C * H * W

    # Lane-dense layout: wide last dim (multiple of 128) for unmasked vector stores.
    LW = 1024 if N >= 1024 else 128
    n_rows = -(-N // LW)
    TM = 64 if n_rows >= 64 else n_rows          # row-tile; 64x1024 keeps v7x VMEM happy
    n_rows_pad = -(-n_rows // TM) * TM
    Npad = n_rows_pad * LW

    xf = x.reshape(-1).astype(jnp.float32)
    if Npad != N:
        xf = jnp.pad(xf, (0, Npad - N))
    x2 = xf.reshape(n_rows_pad, LW)

    # Uniform [0,1) draws for the T Poisson steps (rand_like semantics).
    u = jax.random.uniform(key, (T, n_rows_pad, LW), dtype=jnp.float32)

    grid = (n_rows_pad // TM,)
    n_planes = T + n_bits

    bytes_accessed = (1 + T) * Npad * 4 + n_planes * Npad * jnp.dtype(out_dtype).itemsize
    out = pl.pallas_call(
        functools.partial(_mixed_encoder_kernel, T=T, n_bits=n_bits),
        out_shape=jax.ShapeDtypeStruct((n_planes, n_rows_pad, LW), out_dtype),
        grid=grid,
        in_specs=[
            pl.BlockSpec((TM, LW), lambda i: (i, 0)),
            pl.BlockSpec((T, TM, LW), lambda i: (0, i, 0)),
        ],
        out_specs=pl.BlockSpec((n_planes, TM, LW), lambda i: (0, i, 0)),
        compiler_params=pltpu.CompilerParams(
            dimension_semantics=("parallel",),          # tiles independent -> megacore on v7x
            vmem_limit_bytes=32 * 1024 * 1024,
        ),
        cost_estimate=pl.CostEstimate(
            flops=2 * n_planes * Npad,
            transcendentals=0,
            bytes_accessed=bytes_accessed,
        ),
    )(x2, u)

    out = out.reshape(n_planes, Npad)[:, :N]
    return out.reshape(n_planes, B, C, H, W)


if __name__ == "__main__":
    key = jax.random.PRNGKey(0)
    kx, ku = jax.random.split(key)
    B, C, H, W = 2, 3, 16, 16
    T = 10
    # Integer-valued image in [0, 255] stored as float (like a PyTorch uint8 image cast to float)
    x = jax.random.randint(kx, (B, C, H, W), 0, 256).astype(jnp.float32)

    out = mixed_encoder(x, ku, T=T)
    out = jax.block_until_ready(out)

    assert out.shape == (T + 8, B, C, H, W), out.shape
    assert out.dtype == jnp.float32

    # Sanity: Poisson-encoded part is binary {0, 1}
    spikes = out[:T]
    assert bool(jnp.all((spikes == 0.0) | (spikes == 1.0)))

    # Sanity: bit-planes reconstruct the original integer pixel values
    planes = out[T:]
    weights = (2.0 ** jnp.arange(8, dtype=jnp.float32)).reshape(8, 1, 1, 1, 1)
    recon = jnp.sum(planes * weights, axis=0)
    assert bool(jnp.all(recon == x))

    # Sanity: spike rate roughly tracks intensity (loose statistical check)
    mean_rate = float(jnp.mean(spikes))
    mean_intensity = float(jnp.mean(x / 255.0))
    assert abs(mean_rate - mean_intensity) < 0.1

    print("KERNEL_OK")
</pallas_src>

<mosaic_0001>
module attributes {stable_mosaic.version = 11 : i64} {
  func.func @_mixed_encoder_kernel(%arg0: i32, %arg1: memref<2x1024xf32, #tpu.memory_space<vmem>>, %arg2: memref<10x2x1024xf32, #tpu.memory_space<vmem>>, %arg3: memref<18x2x1024xf32, #tpu.memory_space<vmem>>) attributes {dimension_semantics = [#tpu.dimension_semantics<parallel>], iteration_bounds = array<i64: 1>, scalar_prefetch = 0 : i64, scratch_operands = 0 : i64, tpu.core_type = #tpu.core_type<tc>, window_params = [{transform_indices = @transform_0, window_bounds = array<i64: 2, 1024>}, {transform_indices = @transform_1, window_bounds = array<i64: 10, 2, 1024>}, {transform_indices = @transform_2, window_bounds = array<i64: 18, 2, 1024>}]} {
    %c0 = arith.constant 0 : index
    %c0_0 = arith.constant 0 : index
    %0 = vector.load %arg1[%c0, %c0_0] : memref<2x1024xf32, #tpu.memory_space<vmem>>, vector<2x1024xf32>
    %cst = arith.constant 0.00392156886 : f32
    %1 = vector.broadcast %cst : f32 to vector<2x1024xf32>
    %2 = arith.mulf %0, %1 : vector<2x1024xf32>
    %c0_1 = arith.constant 0 : index
    %c0_2 = arith.constant 0 : index
    %c0_3 = arith.constant 0 : index
    %3 = vector.load %arg2[%c0_1, %c0_2, %c0_3] : memref<10x2x1024xf32, #tpu.memory_space<vmem>>, vector<1x2x1024xf32>
    %4 = vector.shape_cast %3 : vector<1x2x1024xf32> to vector<2x1024xf32>
    %5 = arith.cmpf ole, %4, %2 : vector<2x1024xf32>
    %6 = arith.extui %5 : vector<2x1024xi1> to vector<2x1024xi32>
    %7 = arith.sitofp %6 : vector<2x1024xi32> to vector<2x1024xf32>
    %c0_4 = arith.constant 0 : index
    %c0_5 = arith.constant 0 : index
    %c0_6 = arith.constant 0 : index
    %8 = vector.load %arg3[%c0_4, %c0_5, %c0_6] : memref<18x2x1024xf32, #tpu.memory_space<vmem>>, vector<1x2x1024xf32>
    %9 = vector.shape_cast %8 : vector<1x2x1024xf32> to vector<2x1024xf32>
    %10 = vector.shape_cast %7 : vector<2x1024xf32> to vector<1x2x1024xf32>
    tpu.vector_store %arg3[%c0_4, %c0_5, %c0_6], %10 {strides = array<i32>} : memref<18x2x1024xf32, #tpu.memory_space<vmem>>, vector<1x2x1024xf32>,
    %c1 = arith.constant 1 : index
    %c0_7 = arith.constant 0 : index
    %c0_8 = arith.constant 0 : index
    %11 = vector.load %arg2[%c1, %c0_7, %c0_8] : memref<10x2x1024xf32, #tpu.memory_space<vmem>>, vector<1x2x1024xf32>
    %12 = vector.shape_cast %11 : vector<1x2x1024xf32> to vector<2x1024xf32>
    %13 = arith.cmpf ole, %12, %2 : vector<2x1024xf32>
    %14 = arith.extui %13 : vector<2x1024xi1> to vector<2x1024xi32>
    %15 = arith.sitofp %14 : vector<2x1024xi32> to vector<2x1024xf32>
    %c1_9 = arith.constant 1 : index
    %c0_10 = arith.constant 0 : index
    %c0_11 = arith.constant 0 : index
    %16 = vector.load %arg3[%c1_9, %c0_10, %c0_11] : memref<18x2x1024xf32, #tpu.memory_space<vmem>>, vector<1x2x1024xf32>
    %17 = vector.shape_cast %16 : vector<1x2x1024xf32> to vector<2x1024xf32>
    %18 = vector.shape_cast %15 : vector<2x1024xf32> to vector<1x2x1024xf32>
    tpu.vector_store %arg3[%c1_9, %c0_10, %c0_11], %18 {strides = array<i32>} : memref<18x2x1024xf32, #tpu.memory_space<vmem>>, vector<1x2x1024xf32>,
    %c2 = arith.constant 2 : index
    %c0_12 = arith.constant 0 : index
    %c0_13 = arith.constant 0 : index
    %19 = vector.load %arg2[%c2, %c0_12, %c0_13] : memref<10x2x1024xf32, #tpu.memory_space<vmem>>, vector<1x2x1024xf32>
    %20 = vector.shape_cast %19 : vector<1x2x1024xf32> to vector<2x1024xf32>
    %21 = arith.cmpf ole, %20, %2 : vector<2x1024xf32>
    %22 = arith.extui %21 : vector<2x1024xi1> to vector<2x1024xi32>
    %23 = arith.sitofp %22 : vector<2x1024xi32> to vector<2x1024xf32>
    %c2_14 = arith.constant 2 : index
    %c0_15 = arith.constant 0 : index
    %c0_16 = arith.constant 0 : index
    %24 = vector.load %arg3[%c2_14, %c0_15, %c0_16] : memref<18x2x1024xf32, #tpu.memory_space<vmem>>, vector<1x2x1024xf32>
    %25 = vector.shape_cast %24 : vector<1x2x1024xf32> to vector<2x1024xf32>
    %26 = vector.shape_cast %23 : vector<2x1024xf32> to vector<1x2x1024xf32>
    tpu.vector_store %arg3[%c2_14, %c0_15, %c0_16], %26 {strides = array<i32>} : memref<18x2x1024xf32, #tpu.memory_space<vmem>>, vector<1x2x1024xf32>,
    %c3 = arith.constant 3 : index
    %c0_17 = arith.constant 0 : index
    %c0_18 = arith.constant 0 : index
    %27 = vector.load %arg2[%c3, %c0_17, %c0_18] : memref<10x2x1024xf32, #tpu.memory_space<vmem>>, vector<1x2x1024xf32>
    %28 = vector.shape_cast %27 : vector<1x2x1024xf32> to vector<2x1024xf32>
    %29 = arith.cmpf ole, %28, %2 : vector<2x1024xf32>
    %30 = arith.extui %29 : vector<2x1024xi1> to vector<2x1024xi32>
    %31 = arith.sitofp %30 : vector<2x1024xi32> to vector<2x1024xf32>
    %c3_19 = arith.constant 3 : index
    %c0_20 = arith.constant 0 : index
    %c0_21 = arith.constant 0 : index
    %32 = vector.load %arg3[%c3_19, %c0_20, %c0_21] : memref<18x2x1024xf32, #tpu.memory_space<vmem>>, vector<1x2x1024xf32>
    %33 = vector.shape_cast %32 : vector<1x2x1024xf32> to vector<2x1024xf32>
    %34 = vector.shape_cast %31 : vector<2x1024xf32> to vector<1x2x1024xf32>
    tpu.vector_store %arg3[%c3_19, %c0_20, %c0_21], %34 {strides = array<i32>} : memref<18x2x1024xf32, #tpu.memory_space<vmem>>, vector<1x2x1024xf32>,
    %c4 = arith.constant 4 : index
    %c0_22 = arith.constant 0 : index
    %c0_23 = arith.constant 0 : index
    %35 = vector.load %arg2[%c4, %c0_22, %c0_23] : memref<10x2x1024xf32, #tpu.memory_space<vmem>>, vector<1x2x1024xf32>
    %36 = vector.shape_cast %35 : vector<1x2x1024xf32> to vector<2x1024xf32>
    %37 = arith.cmpf ole, %36, %2 : vector<2x1024xf32>
    %38 = arith.extui %37 : vector<2x1024xi1> to vector<2x1024xi32>
    %39 = arith.sitofp %38 : vector<2x1024xi32> to vector<2x1024xf32>
    %c4_24 = arith.constant 4 : index
    %c0_25 = arith.constant 0 : index
    %c0_26 = arith.constant 0 : index
    %40 = vector.load %arg3[%c4_24, %c0_25, %c0_26] : memref<18x2x1024xf32, #tpu.memory_space<vmem>>, vector<1x2x1024xf32>
    %41 = vector.shape_cast %40 : vector<1x2x1024xf32> to vector<2x1024xf32>
    %42 = vector.shape_cast %39 : vector<2x1024xf32> to vector<1x2x1024xf32>
    tpu.vector_store %arg3[%c4_24, %c0_25, %c0_26], %42 {strides = array<i32>} : memref<18x2x1024xf32, #tpu.memory_space<vmem>>, vector<1x2x1024xf32>,
    %c5 = arith.constant 5 : index
    %c0_27 = arith.constant 0 : index
    %c0_28 = arith.constant 0 : index
    %43 = vector.load %arg2[%c5, %c0_27, %c0_28] : memref<10x2x1024xf32, #tpu.memory_space<vmem>>, vector<1x2x1024xf32>
    %44 = vector.shape_cast %43 : vector<1x2x1024xf32> to vector<2x1024xf32>
    %45 = arith.cmpf ole, %44, %2 : vector<2x1024xf32>
    %46 = arith.extui %45 : vector<2x1024xi1> to vector<2x1024xi32>
    %47 = arith.sitofp %46 : vector<2x1024xi32> to vector<2x1024xf32>
    %c5_29 = arith.constant 5 : index
    %c0_30 = arith.constant 0 : index
    %c0_31 = arith.constant 0 : index
    %48 = vector.load %arg3[%c5_29, %c0_30, %c0_31] : memref<18x2x1024xf32, #tpu.memory_space<vmem>>, vector<1x2x1024xf32>
    %49 = vector.shape_cast %48 : vector<1x2x1024xf32> to vector<2x1024xf32>
    %50 = vector.shape_cast %47 : vector<2x1024xf32> to vector<1x2x1024xf32>
    tpu.vector_store %arg3[%c5_29, %c0_30, %c0_31], %50 {strides = array<i32>} : memref<18x2x1024xf32, #tpu.memory_space<vmem>>, vector<1x2x1024xf32>,
    %c6 = arith.constant 6 : index
    %c0_32 = arith.constant 0 : index
    %c0_33 = arith.constant 0 : index
    %51 = vector.load %arg2[%c6, %c0_32, %c0_33] : memref<10x2x1024xf32, #tpu.memory_space<vmem>>, vector<1x2x1024xf32>
    %52 = vector.shape_cast %51 : vector<1x2x1024xf32> to vector<2x1024xf32>
    %53 = arith.cmpf ole, %52, %2 : vector<2x1024xf32>
    %54 = arith.extui %53 : vector<2x1024xi1> to vector<2x1024xi32>
    %55 = arith.sitofp %54 : vector<2x1024xi32> to vector<2x1024xf32>
    %c6_34 = arith.constant 6 : index
    %c0_35 = arith.constant 0 : index
    %c0_36 = arith.constant 0 : index
    %56 = vector.load %arg3[%c6_34, %c0_35, %c0_36] : memref<18x2x1024xf32, #tpu.memory_space<vmem>>, vector<1x2x1024xf32>
    %57 = vector.shape_cast %56 : vector<1x2x1024xf32> to vector<2x1024xf32>
    %58 = vector.shape_cast %55 : vector<2x1024xf32> to vector<1x2x1024xf32>
    tpu.vector_store %arg3[%c6_34, %c0_35, %c0_36], %58 {strides = array<i32>} : memref<18x2x1024xf32, #tpu.memory_space<vmem>>, vector<1x2x1024xf32>,
    %c7 = arith.constant 7 : index
    %c0_37 = arith.constant 0 : index
    %c0_38 = arith.constant 0 : index
    %59 = vector.load %arg2[%c7, %c0_37, %c0_38] : memref<10x2x1024xf32, #tpu.memory_space<vmem>>, vector<1x2x1024xf32>
    %60 = vector.shape_cast %59 : vector<1x2x1024xf32> to vector<2x1024xf32>
    %61 = arith.cmpf ole, %60, %2 : vector<2x1024xf32>
    %62 = arith.extui %61 : vector<2x1024xi1> to vector<2x1024xi32>
    %63 = arith.sitofp %62 : vector<2x1024xi32> to vector<2x1024xf32>
    %c7_39 = arith.constant 7 : index
    %c0_40 = arith.constant 0 : index
    %c0_41 = arith.constant 0 : index
    %64 = vector.load %arg3[%c7_39, %c0_40, %c0_41] : memref<18x2x1024xf32, #tpu.memory_space<vmem>>, vector<1x2x1024xf32>
    %65 = vector.shape_cast %64 : vector<1x2x1024xf32> to vector<2x1024xf32>
    %66 = vector.shape_cast %63 : vector<2x1024xf32> to vector<1x2x1024xf32>
    tpu.vector_store %arg3[%c7_39, %c0_40, %c0_41], %66 {strides = array<i32>} : memref<18x2x1024xf32, #tpu.memory_space<vmem>>, vector<1x2x1024xf32>,
    %c8 = arith.constant 8 : index
    %c0_42 = arith.constant 0 : index
    %c0_43 = arith.constant 0 : index
    %67 = vector.load %arg2[%c8, %c0_42, %c0_43] : memref<10x2x1024xf32, #tpu.memory_space<vmem>>, vector<1x2x1024xf32>
    %68 = vector.shape_cast %67 : vector<1x2x1024xf32> to vector<2x1024xf32>
    %69 = arith.cmpf ole, %68, %2 : vector<2x1024xf32>
    %70 = arith.extui %69 : vector<2x1024xi1> to vector<2x1024xi32>
    %71 = arith.sitofp %70 : vector<2x1024xi32> to vector<2x1024xf32>
    %c8_44 = arith.constant 8 : index
    %c0_45 = arith.constant 0 : index
    %c0_46 = arith.constant 0 : index
    %72 = vector.load %arg3[%c8_44, %c0_45, %c0_46] : memref<18x2x1024xf32, #tpu.memory_space<vmem>>, vector<1x2x1024xf32>
    %73 = vector.shape_cast %72 : vector<1x2x1024xf32> to vector<2x1024xf32>
    %74 = vector.shape_cast %71 : vector<2x1024xf32> to vector<1x2x1024xf32>
    tpu.vector_store %arg3[%c8_44, %c0_45, %c0_46], %74 {strides = array<i32>} : memref<18x2x1024xf32, #tpu.memory_space<vmem>>, vector<1x2x1024xf32>,
    %c9 = arith.constant 9 : index
    %c0_47 = arith.constant 0 : index
    %c0_48 = arith.constant 0 : index
    %75 = vector.load %arg2[%c9, %c0_47, %c0_48] : memref<10x2x1024xf32, #tpu.memory_space<vmem>>, vector<1x2x1024xf32>
    %76 = vector.shape_cast %75 : vector<1x2x1024xf32> to vector<2x1024xf32>
    %77 = arith.cmpf ole, %76, %2 : vector<2x1024xf32>
    %78 = arith.extui %77 : vector<2x1024xi1> to vector<2x1024xi32>
    %79 = arith.sitofp %78 : vector<2x1024xi32> to vector<2x1024xf32>
    %c9_49 = arith.constant 9 : index
    %c0_50 = arith.constant 0 : index
    %c0_51 = arith.constant 0 : index
    %80 = vector.load %arg3[%c9_49, %c0_50, %c0_51] : memref<18x2x1024xf32, #tpu.memory_space<vmem>>, vector<1x2x1024xf32>
    %81 = vector.shape_cast %80 : vector<1x2x1024xf32> to vector<2x1024xf32>
    %82 = vector.shape_cast %79 : vector<2x1024xf32> to vector<1x2x1024xf32>
    tpu.vector_store %arg3[%c9_49, %c0_50, %c0_51], %82 {strides = array<i32>} : memref<18x2x1024xf32, #tpu.memory_space<vmem>>, vector<1x2x1024xf32>,
    %83 = arith.fptosi %0 : vector<2x1024xf32> to vector<2x1024xi32>
    %c0_i32 = arith.constant 0 : i32
    %84 = vector.broadcast %c0_i32 : i32 to vector<2x1024xi32>
    %85 = arith.shrsi %83, %84 : vector<2x1024xi32>
    %c1_i32 = arith.constant 1 : i32
    %86 = vector.broadcast %c1_i32 : i32 to vector<2x1024xi32>
    %87 = arith.andi %85, %86 : vector<2x1024xi32>
    %88 = arith.sitofp %87 : vector<2x1024xi32> to vector<2x1024xf32>
    %c10 = arith.constant 10 : index
    %c0_52 = arith.constant 0 : index
    %c0_53 = arith.constant 0 : index
    %89 = vector.load %arg3[%c10, %c0_52, %c0_53] : memref<18x2x1024xf32, #tpu.memory_space<vmem>>, vector<1x2x1024xf32>
    %90 = vector.shape_cast %89 : vector<1x2x1024xf32> to vector<2x1024xf32>
    %91 = vector.shape_cast %88 : vector<2x1024xf32> to vector<1x2x1024xf32>
    tpu.vector_store %arg3[%c10, %c0_52, %c0_53], %91 {strides = array<i32>} : memref<18x2x1024xf32, #tpu.memory_space<vmem>>, vector<1x2x1024xf32>,
    %c1_i32_54 = arith.constant 1 : i32
    %92 = vector.broadcast %c1_i32_54 : i32 to vector<2x1024xi32>
    %93 = arith.shrsi %83, %92 : vector<2x1024xi32>
    %c1_i32_55 = arith.constant 1 : i32
    %94 = vector.broadcast %c1_i32_55 : i32 to vector<2x1024xi32>
    %95 = arith.andi %93, %94 : vector<2x1024xi32>
    %96 = arith.sitofp %95 : vector<2x1024xi32> to vector<2x1024xf32>
    %c11 = arith.constant 11 : index
    %c0_56 = arith.constant 0 : index
    %c0_57 = arith.constant 0 : index
    %97 = vector.load %arg3[%c11, %c0_56, %c0_57] : memref<18x2x1024xf32, #tpu.memory_space<vmem>>, vector<1x2x1024xf32>
    %98 = vector.shape_cast %97 : vector<1x2x1024xf32> to vector<2x1024xf32>
    %99 = vector.shape_cast %96 : vector<2x1024xf32> to vector<1x2x1024xf32>
    tpu.vector_store %arg3[%c11, %c0_56, %c0_57], %99 {strides = array<i32>} : memref<18x2x1024xf32, #tpu.memory_space<vmem>>, vector<1x2x1024xf32>,
    %c2_i32 = arith.constant 2 : i32
    %100 = vector.broadcast %c2_i32 : i32 to vector<2x1024xi32>
    %101 = arith.shrsi %83, %100 : vector<2x1024xi32>
    %c1_i32_58 = arith.constant 1 : i32
    %102 = vector.broadcast %c1_i32_58 : i32 to vector<2x1024xi32>
    %103 = arith.andi %101, %102 : vector<2x1024xi32>
    %104 = arith.sitofp %103 : vector<2x1024xi32> to vector<2x1024xf32>
    %c12 = arith.constant 12 : index
    %c0_59 = arith.constant 0 : index
    %c0_60 = arith.constant 0 : index
    %105 = vector.load %arg3[%c12, %c0_59, %c0_60] : memref<18x2x1024xf32, #tpu.memory_space<vmem>>, vector<1x2x1024xf32>
    %106 = vector.shape_cast %105 : vector<1x2x1024xf32> to vector<2x1024xf32>
    %107 = vector.shape_cast %104 : vector<2x1024xf32> to vector<1x2x1024xf32>
    tpu.vector_store %arg3[%c12, %c0_59, %c0_60], %107 {strides = array<i32>} : memref<18x2x1024xf32, #tpu.memory_space<vmem>>, vector<1x2x1024xf32>,
    %c3_i32 = arith.constant 3 : i32
    %108 = vector.broadcast %c3_i32 : i32 to vector<2x1024xi32>
    %109 = arith.shrsi %83, %108 : vector<2x1024xi32>
    %c1_i32_61 = arith.constant 1 : i32
    %110 = vector.broadcast %c1_i32_61 : i32 to vector<2x1024xi32>
    %111 = arith.andi %109, %110 : vector<2x1024xi32>
    %112 = arith.sitofp %111 : vector<2x1024xi32> to vector<2x1024xf32>
    %c13 = arith.constant 13 : index
    %c0_62 = arith.constant 0 : index
    %c0_63 = arith.constant 0 : index
    %113 = vector.load %arg3[%c13, %c0_62, %c0_63] : memref<18x2x1024xf32, #tpu.memory_space<vmem>>, vector<1x2x1024xf32>
    %114 = vector.shape_cast %113 : vector<1x2x1024xf32> to vector<2x1024xf32>
    %115 = vector.shape_cast %112 : vector<2x1024xf32> to vector<1x2x1024xf32>
    tpu.vector_store %arg3[%c13, %c0_62, %c0_63], %115 {strides = array<i32>} : memref<18x2x1024xf32, #tpu.memory_space<vmem>>, vector<1x2x1024xf32>,
    %c4_i32 = arith.constant 4 : i32
    %116 = vector.broadcast %c4_i32 : i32 to vector<2x1024xi32>
    %117 = arith.shrsi %83, %116 : vector<2x1024xi32>
    %c1_i32_64 = arith.constant 1 : i32
    %118 = vector.broadcast %c1_i32_64 : i32 to vector<2x1024xi32>
    %119 = arith.andi %117, %118 : vector<2x1024xi32>
    %120 = arith.sitofp %119 : vector<2x1024xi32> to vector<2x1024xf32>
    %c14 = arith.constant 14 : index
    %c0_65 = arith.constant 0 : index
    %c0_66 = arith.constant 0 : index
    %121 = vector.load %arg3[%c14, %c0_65, %c0_66] : memref<18x2x1024xf32, #tpu.memory_space<vmem>>, vector<1x2x1024xf32>
    %122 = vector.shape_cast %121 : vector<1x2x1024xf32> to vector<2x1024xf32>
    %123 = vector.shape_cast %120 : vector<2x1024xf32> to vector<1x2x1024xf32>
    tpu.vector_store %arg3[%c14, %c0_65, %c0_66], %123 {strides = array<i32>} : memref<18x2x1024xf32, #tpu.memory_space<vmem>>, vector<1x2x1024xf32>,
    %c5_i32 = arith.constant 5 : i32
    %124 = vector.broadcast %c5_i32 : i32 to vector<2x1024xi32>
    %125 = arith.shrsi %83, %124 : vector<2x1024xi32>
    %c1_i32_67 = arith.constant 1 : i32
    %126 = vector.broadcast %c1_i32_67 : i32 to vector<2x1024xi32>
    %127 = arith.andi %125, %126 : vector<2x1024xi32>
    %128 = arith.sitofp %127 : vector<2x1024xi32> to vector<2x1024xf32>
    %c15 = arith.constant 15 : index
    %c0_68 = arith.constant 0 : index
    %c0_69 = arith.constant 0 : index
    %129 = vector.load %arg3[%c15, %c0_68, %c0_69] : memref<18x2x1024xf32, #tpu.memory_space<vmem>>, vector<1x2x1024xf32>
    %130 = vector.shape_cast %129 : vector<1x2x1024xf32> to vector<2x1024xf32>
    %131 = vector.shape_cast %128 : vector<2x1024xf32> to vector<1x2x1024xf32>
    tpu.vector_store %arg3[%c15, %c0_68, %c0_69], %131 {strides = array<i32>} : memref<18x2x1024xf32, #tpu.memory_space<vmem>>, vector<1x2x1024xf32>,
    %c6_i32 = arith.constant 6 : i32
    %132 = vector.broadcast %c6_i32 : i32 to vector<2x1024xi32>
    %133 = arith.shrsi %83, %132 : vector<2x1024xi32>
    %c1_i32_70 = arith.constant 1 : i32
    %134 = vector.broadcast %c1_i32_70 : i32 to vector<2x1024xi32>
    %135 = arith.andi %133, %134 : vector<2x1024xi32>
    %136 = arith.sitofp %135 : vector<2x1024xi32> to vector<2x1024xf32>
    %c16 = arith.constant 16 : index
    %c0_71 = arith.constant 0 : index
    %c0_72 = arith.constant 0 : index
    %137 = vector.load %arg3[%c16, %c0_71, %c0_72] : memref<18x2x1024xf32, #tpu.memory_space<vmem>>, vector<1x2x1024xf32>
    %138 = vector.shape_cast %137 : vector<1x2x1024xf32> to vector<2x1024xf32>
    %139 = vector.shape_cast %136 : vector<2x1024xf32> to vector<1x2x1024xf32>
    tpu.vector_store %arg3[%c16, %c0_71, %c0_72], %139 {strides = array<i32>} : memref<18x2x1024xf32, #tpu.memory_space<vmem>>, vector<1x2x1024xf32>,
    %c7_i32 = arith.constant 7 : i32
    %140 = vector.broadcast %c7_i32 : i32 to vector<2x1024xi32>
    %141 = arith.shrsi %83, %140 : vector<2x1024xi32>
    %c1_i32_73 = arith.constant 1 : i32
    %142 = vector.broadcast %c1_i32_73 : i32 to vector<2x1024xi32>
    %143 = arith.andi %141, %142 : vector<2x1024xi32>
    %144 = arith.sitofp %143 : vector<2x1024xi32> to vector<2x1024xf32>
    %c17 = arith.constant 17 : index
    %c0_74 = arith.constant 0 : index
    %c0_75 = arith.constant 0 : index
    %145 = vector.load %arg3[%c17, %c0_74, %c0_75] : memref<18x2x1024xf32, #tpu.memory_space<vmem>>, vector<1x2x1024xf32>
    %146 = vector.shape_cast %145 : vector<1x2x1024xf32> to vector<2x1024xf32>
    %147 = vector.shape_cast %144 : vector<2x1024xf32> to vector<1x2x1024xf32>
    tpu.vector_store %arg3[%c17, %c0_74, %c0_75], %147 {strides = array<i32>} : memref<18x2x1024xf32, #tpu.memory_space<vmem>>, vector<1x2x1024xf32>,
    return
  }
  func.func @transform_0(%arg0: i32) -> (i32, i32) {
    %c0_i32 = arith.constant 0 : i32
    %c0_i32_0 = arith.constant 0 : i32
    return %arg0, %c0_i32 : i32, i32
  }
  func.func @transform_1(%arg0: i32) -> (i32, i32, i32) {
    %c0_i32 = arith.constant 0 : i32
    %c0_i32_0 = arith.constant 0 : i32
    %c0_i32_1 = arith.constant 0 : i32
    return %c0_i32, %arg0, %c0_i32_0 : i32, i32, i32
  }
  func.func @transform_2(%arg0: i32) -> (i32, i32, i32) {
    %c0_i32 = arith.constant 0 : i32
    %c0_i32_0 = arith.constant 0 : i32
    %c0_i32_1 = arith.constant 0 : i32
    return %c0_i32, %arg0, %c0_i32_0 : i32, i32, i32
  }
}

</mosaic_0001>

<bundles_post_ra>
// kernel: tpu_custom_call.1
= control target key start
LH: loop header
LB: loop body
LE: loop exit
PB: predicated region body
PF: predicated region fallthrough
CT: control target
= control target key end

     0   :  { %7 = vsyncpa [#allocation3], 0  ;;  %s484_s0 = inlined_call_operand.hbm [shape: f32[2,1024], index: 0, kind: input, shape index: {}]   ;;  %s485_s1 = inlined_call_operand.hbm [shape: f32[10,2,1024], index: 1, kind: input, shape index: {}]   ;;  %s486_s2 = inlined_call_operand.hbm [shape: f32[18,2,1024], index: 2, kind: output, shape index: {}]  }
   0x1   :  { %8 = vsyncpa [#allocation6], 0 }
   0x2   :  { %9 = vsyncpa [#allocation4], 0  ;;  %s15_s11 = sshll.u32 %s484_s0, 4  ;;  %s370_s12 = smov [#allocation2]   ;;  %s16_s11 = int_to_ptr.hbm [resolvable:$true] %s15_s11 }
   0x3   :  { %s17_s13 = sshll.u32 %s370_s12, 4  ;;  %s25_s16 = sshll.u32 %s485_s1, 4  ;;  %s18_s13 = int_to_ptr.vmem [resolvable:$true] %s17_s13  ;;  %s26_s16 = int_to_ptr.hbm [resolvable:$true] %s25_s16 }
   0x4   :  { %20 = dma.hbm_to_vmem [thread:$0]  %s16_s11, 256, %s18_s13, [#allocation3]  }
   0x5   :  { %s371_s17 = smov [#allocation5]   ;;  %s372_s19 = smov 256  }
   0x6   :  { %s27_s18 = sshll.u32 %s371_s17, 4  ;;  %s373_s20 = smov 16   ;;  %s28_s18 = int_to_ptr.vmem [resolvable:$true] %s27_s18 }
   0x7   :  { %33 = dma.hbm_to_vmem [thread:$0]  %s26_s16, 2560, %s28_s18, [#allocation6], %s372_s19, %s372_s19, %s373_s20  }
   0x8   :  { %364 = dma.done.wait [#allocation3], 256  }
   0x9   :  { %365 = vsyncadd [#allocation3], 4294967040 }
   0xa   :  { %366 = dma.done.wait [#allocation6], 2560  }
   0xb   :  { %367 = vsyncadd [#allocation6], 4294964736  ;;  %v400_v0 = vld [vmem:[#allocation2] sm:$0xff]  ;;  %v46_v1 = vld [vmem:[#allocation5] sm:$0xff]  ;;  %v374_v12 = vmov 0.0   ;;  %s375_s0 = smov [#allocation7]  }
   0xc   :  { %v402_v2 = vld [vmem:[#allocation2 + $0x8] sm:$0xff]  ;;  %v405_v3 = vmul.f32 0.003921569, %v400_v0  ;;  %v47_v5 = vld [vmem:[#allocation5 + $0x8] sm:$0xff]  ;;  %v57_v6 = vld [vmem:[#allocation5 + $0x10] sm:$0xff]  ;;  %v277_v25 = vceil.f32 %v400_v0  ;;  %v278_v26 = vfloor.f32 %v400_v0  ;;  %vm276_vm12 = vcmp.lt.s32.totalorder %v400_v0, 0 }
   0xd   :  { %v408_v4 = vmul.f32 0.003921569, %v402_v2  ;;  %v58_v7 = vld [vmem:[#allocation5 + $0x18] sm:$0xff]  ;;  %v69_v8 = vld [vmem:[#allocation5 + $0x20] sm:$0xff]  ;;  %v70_v9 = vld [vmem:[#allocation5 + $0x28] sm:$0xff]  ;;  %v282_v29 = vceil.f32 %v402_v2  ;;  %v283_v30 = vfloor.f32 %v402_v2  ;;  %vm281_vm13 = vcmp.lt.s32.totalorder %v402_v2, 0 }
   0xe   :  { %vm48_vm0 = vcmp.le.f32.partialorder %v46_v1, %v405_v3  ;;  %vm59_vm2 = vcmp.le.f32.partialorder %v57_v6, %v405_v3  ;;  %v81_v10 = vld [vmem:[#allocation5 + $0x30] sm:$0xff]  ;;  %v82_v11 = vld [vmem:[#allocation5 + $0x38] sm:$0xff]  ;;  %v93_v16 = vld [vmem:[#allocation5 + $0x40] sm:$0xff]  ;;  %vm71_vm4 = vcmp.le.f32.partialorder %v69_v8, %v405_v3  ;;  %v279_v39 = vsel %vm276_vm12, %v277_v25, %v278_v26  ;;  %s240_s1 = sshll.u32 %s375_s0, 4  ;;  %s242_s23 = sshll.u32 %s486_s2, 4  ;;  %s241_s1 = int_to_ptr.vmem [resolvable:$true] %s240_s1  ;;  %s243_s23 = int_to_ptr.hbm [resolvable:$true] %s242_s23 }
   0xf   :  { %vm49_vm1 = vcmp.le.f32.partialorder %v47_v5, %v408_v4  ;;  %vm60_vm3 = vcmp.le.f32.partialorder %v58_v7, %v408_v4  ;;  %v256_v13 = vsel %vm48_vm0, 1.0, %v374_v12  ;;  %v258_v15 = vsel %vm59_vm2, 1.0, %v374_v12  ;;  %v94_v18 = vld [vmem:[#allocation5 + $0x48] sm:$0xff]  ;;  %v105_v20 = vld [vmem:[#allocation5 + $0x50] sm:$0xff]  ;;  %v106_v22 = vld [vmem:[#allocation5 + $0x58] sm:$0xff] }
  0x10   :  { %v257_v14 = vsel %vm49_vm1, 1.0, %v374_v12  ;;  %54 = vst [vmem:[#allocation7] sm:$0xff] %v256_v13  ;;  %v259_v17 = vsel %vm60_vm3, 1.0, %v374_v12  ;;  %vm72_vm5 = vcmp.le.f32.partialorder %v70_v9, %v408_v4  ;;  %vm83_vm6 = vcmp.le.f32.partialorder %v81_v10, %v405_v3  ;;  %v117_v24 = vld [vmem:[#allocation5 + $0x60] sm:$0xff]  ;;  %v118_v28 = vld [vmem:[#allocation5 + $0x68] sm:$0xff]  ;;  %v129_v32 = vld [vmem:[#allocation5 + $0x70] sm:$0xff] }
  0x11   :  { %55 = vst [vmem:[#allocation7 + $0x8] sm:$0xff] %v257_v14  ;;  %v260_v19 = vsel %vm71_vm4, 1.0, %v374_v12  ;;  %vm84_vm7 = vcmp.le.f32.partialorder %v82_v11, %v408_v4  ;;  %v261_v21 = vsel %vm72_vm5, 1.0, %v374_v12  ;;  %vm95_vm8 = vcmp.le.f32.partialorder %v93_v16, %v405_v3  ;;  %v130_v34 = vld [vmem:[#allocation5 + $0x78] sm:$0xff]  ;;  %v141_v36 = vld [vmem:[#allocation5 + $0x80] sm:$0xff]  ;;  %v142_v38 = vld [vmem:[#allocation5 + $0x88] sm:$0xff] }
  0x12   :  { %66 = vst [vmem:[#allocation7 + $0x10] sm:$0xff] %v258_v15  ;;  %v262_v23 = vsel %vm83_vm6, 1.0, %v374_v12  ;;  %vm96_vm9 = vcmp.le.f32.partialorder %v94_v18, %v408_v4  ;;  %v263_v27 = vsel %vm84_vm7, 1.0, %v374_v12  ;;  %vm107_vm10 = vcmp.le.f32.partialorder %v105_v20, %v405_v3  ;;  %v153_v42 = vld [vmem:[#allocation5 + $0x90] sm:$0xff]  ;;  %v154_v46 = vld [vmem:[#allocation5 + $0x98] sm:$0xff] }
  0x13   :  { %67 = vst [vmem:[#allocation7 + $0x18] sm:$0xff] %v259_v17  ;;  %v264_v31 = vsel %vm95_vm8, 1.0, %v374_v12  ;;  %vm108_vm11 = vcmp.le.f32.partialorder %v106_v22, %v408_v4  ;;  %v265_v33 = vsel %vm96_vm9, 1.0, %v374_v12  ;;  %vm119_vm14 = vcmp.le.f32.partialorder %v117_v24, %v405_v3 }
  0x14   :  { %78 = vst [vmem:[#allocation7 + $0x20] sm:$0xff] %v260_v19  ;;  %v266_v35 = vsel %vm107_vm10, 1.0, %v374_v12  ;;  %vm120_vm15 = vcmp.le.f32.partialorder %v118_v28, %v408_v4  ;;  %v267_v37 = vsel %vm108_vm11, 1.0, %v374_v12  ;;  %vm131_vm0 = vcmp.le.f32.partialorder %v129_v32, %v405_v3 }
  0x15   :  { %79 = vst [vmem:[#allocation7 + $0x28] sm:$0xff] %v261_v21  ;;  %v284_v40 = vsel %vm281_vm13, %v282_v29, %v283_v30  ;;  %v268_v41 = vsel %vm119_vm14, 1.0, %v374_v12  ;;  %vm132_vm1 = vcmp.le.f32.partialorder %v130_v34, %v408_v4  ;;  %v447_v43 = vcvt.f32.s32 %v279_v39 }
  0x16   :  { %90 = vst [vmem:[#allocation7 + $0x30] sm:$0xff] %v262_v23  ;;  %v449_v44 = vcvt.f32.s32 %v284_v40  ;;  %v269_v45 = vsel %vm120_vm15, 1.0, %v374_v12  ;;  %vm143_vm2 = vcmp.le.f32.partialorder %v141_v36, %v405_v3  ;;  %v270_v47 = vsel %vm131_vm0, 1.0, %v374_v12 }
  0x17   :  { %91 = vst [vmem:[#allocation7 + $0x38] sm:$0xff] %v263_v27  ;;  %vm144_vm3 = vcmp.le.f32.partialorder %v142_v38, %v408_v4  ;;  %v173_v48 = vshra.s32 %v447_v43, 1  ;;  %v271_v50 = vsel %vm132_vm1, 1.0, %v374_v12  ;;  %vm155_vm4 = vcmp.le.f32.partialorder %v153_v42, %v405_v3 }
  0x18   :  { %102 = vst [vmem:[#allocation7 + $0x40] sm:$0xff] %v264_v31  ;;  %v174_v49 = vshra.s32 %v449_v44, 1  ;;  %v166_v51 = vand.u32 1, %v447_v43  ;;  %v182_v52 = vshra.s32 %v447_v43, 2  ;;  %v272_v53 = vsel %vm143_vm2, 1.0, %v374_v12 }
  0x19   :  { %103 = vst [vmem:[#allocation7 + $0x48] sm:$0xff] %v265_v33  ;;  %vm156_vm5 = vcmp.le.f32.partialorder %v154_v46, %v408_v4  ;;  %v167_v54 = vand.u32 1, %v449_v44  ;;  %v183_v55 = vshra.s32 %v449_v44, 2  ;;  %v273_v56 = vsel %vm144_vm3, 1.0, %v374_v12 }
  0x1a   :  { %114 = vst [vmem:[#allocation7 + $0x50] sm:$0xff] %v266_v35  ;;  %v175_v57 = vand.u32 1, %v173_v48  ;;  %v191_v58 = vshra.s32 %v447_v43, 3  ;;  %v274_v59 = vsel %vm155_vm4, 1.0, %v374_v12  ;;  %v176_v60 = vand.u32 1, %v174_v49 }
  0x1b   :  { %115 = vst [vmem:[#allocation7 + $0x58] sm:$0xff] %v267_v37  ;;  %v192_v61 = vshra.s32 %v449_v44, 3  ;;  %v275_v62 = vsel %vm156_vm5, 1.0, %v374_v12  ;;  %v168_v63 = vcvt.s32.f32 %v166_v51  ;;  %v184_v0 = vand.u32 1, %v182_v52 }
  0x1c   :  { %126 = vst [vmem:[#allocation7 + $0x60] sm:$0xff] %v268_v41  ;;  %v200_v1 = vshra.s32 %v447_v43, 4  ;;  %v169_v2 = vcvt.s32.f32 %v167_v54  ;;  %v185_v3 = vand.u32 1, %v183_v55  ;;  %v201_v4 = vshra.s32 %v449_v44, 4 }
  0x1d   :  { %127 = vst [vmem:[#allocation7 + $0x68] sm:$0xff] %v269_v45  ;;  %v177_v5 = vcvt.s32.f32 %v175_v57  ;;  %v193_v6 = vand.u32 1, %v191_v58  ;;  %v209_v7 = vshra.s32 %v447_v43, 5  ;;  %v178_v8 = vcvt.s32.f32 %v176_v60 }
  0x1e   :  { %138 = vst [vmem:[#allocation7 + $0x70] sm:$0xff] %v270_v47  ;;  %v194_v9 = vand.u32 1, %v192_v61  ;;  %v210_v10 = vshra.s32 %v449_v44, 5  ;;  %v186_v11 = vcvt.s32.f32 %v184_v0  ;;  %v202_v12 = vand.u32 1, %v200_v1 }
  0x1f   :  { %139 = vst [vmem:[#allocation7 + $0x78] sm:$0xff] %v271_v50  ;;  %v218_v13 = vshra.s32 %v447_v43, 6  ;;  %v187_v14 = vcvt.s32.f32 %v185_v3  ;;  %v203_v15 = vand.u32 1, %v201_v4  ;;  %v219_v16 = vshra.s32 %v449_v44, 6 }
  0x20   :  { %150 = vst [vmem:[#allocation7 + $0x80] sm:$0xff] %v272_v53  ;;  %v195_v17 = vcvt.s32.f32 %v193_v6  ;;  %v211_v18 = vand.u32 1, %v209_v7  ;;  %v227_v19 = vshra.s32 %v447_v43, 7  ;;  %v196_v20 = vcvt.s32.f32 %v194_v9 }
  0x21   :  { %151 = vst [vmem:[#allocation7 + $0x88] sm:$0xff] %v273_v56  ;;  %v212_v21 = vand.u32 1, %v210_v10  ;;  %v228_v22 = vshra.s32 %v449_v44, 7  ;;  %v204_v23 = vcvt.s32.f32 %v202_v12  ;;  %v220_v24 = vand.u32 1, %v218_v13 }
  0x22   :  { %162 = vst [vmem:[#allocation7 + $0x90] sm:$0xff] %v274_v59  ;;  %v205_v25 = vcvt.s32.f32 %v203_v15  ;;  %v221_v26 = vand.u32 1, %v219_v16  ;;  %v213_v27 = vcvt.s32.f32 %v211_v18  ;;  %v229_v28 = vand.u32 1, %v227_v19 }
  0x23   :  { %163 = vst [vmem:[#allocation7 + $0x98] sm:$0xff] %v275_v62  ;;  %v214_v29 = vcvt.s32.f32 %v212_v21  ;;  %v230_v30 = vand.u32 1, %v228_v22  ;;  %v222_v31 = vcvt.s32.f32 %v220_v24 }
  0x24   :  { %171 = vst [vmem:[#allocation7 + $0xa0] sm:$0xff] %v168_v63  ;;  %v223_v32 = vcvt.s32.f32 %v221_v26  ;;  %v231_v33 = vcvt.s32.f32 %v229_v28 }
  0x25   :  { %172 = vst [vmem:[#allocation7 + $0xa8] sm:$0xff] %v169_v2  ;;  %v232_v34 = vcvt.s32.f32 %v230_v30 }
  0x26   :  { %180 = vst [vmem:[#allocation7 + $0xb0] sm:$0xff] %v177_v5 }
  0x27   :  { %181 = vst [vmem:[#allocation7 + $0xb8] sm:$0xff] %v178_v8 }
  0x28   :  { %189 = vst [vmem:[#allocation7 + $0xc0] sm:$0xff] %v186_v11 }
  0x29   :  { %190 = vst [vmem:[#allocation7 + $0xc8] sm:$0xff] %v187_v14 }
  0x2a   :  { %198 = vst [vmem:[#allocation7 + $0xd0] sm:$0xff] %v195_v17 }
  0x2b   :  { %199 = vst [vmem:[#allocation7 + $0xd8] sm:$0xff] %v196_v20 }
  0x2c   :  { %207 = vst [vmem:[#allocation7 + $0xe0] sm:$0xff] %v204_v23 }
  0x2d   :  { %208 = vst [vmem:[#allocation7 + $0xe8] sm:$0xff] %v205_v25 }
  0x2e   :  { %216 = vst [vmem:[#allocation7 + $0xf0] sm:$0xff] %v213_v27 }
  0x2f   :  { %217 = vst [vmem:[#allocation7 + $0xf8] sm:$0xff] %v214_v29 }
  0x30   :  { %225 = vst [vmem:[#allocation7 + $0x100] sm:$0xff] %v222_v31 }
  0x31   :  { %226 = vst [vmem:[#allocation7 + $0x108] sm:$0xff] %v223_v32 }
  0x32   :  { %234 = vst [vmem:[#allocation7 + $0x110] sm:$0xff] %v231_v33 }
  0x33   :  { %235 = vst [vmem:[#allocation7 + $0x118] sm:$0xff] %v232_v34 }
  0x34   :  { %248 = dma.vmem_to_hbm [thread:$0]  %s241_s1, 4608, %s243_s23, [#allocation4], %s372_s19, %s372_s19, %s373_s20  }
  0x35   :  { %368 = dma.done.wait [#allocation4], 4608  }
  0x36   :  { %369 = vsyncadd [#allocation4], 4294962688 }
  0x37   :  { %253 = vsyncpa [#allocation3], 1 }
  0x38   :  { %254 = vsyncpa [#allocation6], 1 }
  0x39   :  { %255 = vsyncpa [#allocation4], 1 }

</bundles_post_ra>
